<compile_context>
chip_gen: v7x
topology: tpu7x:2x2x1
jax: 0.10.0
libtpu: 0.0.40
codegen_flags: <defaults>
</compile_context>

<pallas_src>
import jax
import jax.numpy as jnp
from jax.experimental import pallas as pl
from jax.experimental.pallas import tpu as pltpu


def _copy_kernel(x_ref, o_ref):
    # Pure streaming copy; all squeeze/reshape logic lives in the wrapper
    # (metadata-only), so the kernel only ever sees lane-dense 2D tiles.
    o_ref[...] = x_ref[...]


def _materialized_copy(y):
    """Physically copy `y` through a tiled Pallas kernel (lane-dense 2D view)."""
    out_shape = y.shape
    dtype = y.dtype
    n = y.size
    if n == 0:
        return y

    # Pick a lane-dense column count (large multiple of 128) that divides n.
    cols = None
    for c in (4096, 2048, 1024, 512, 256, 128):
        if n % c == 0:
            cols = c
            break

    bw_cost = pl.CostEstimate(
        flops=0, transcendentals=0, bytes_accessed=2 * y.nbytes
    )

    if cols is None:
        # Awkward sizes: single full-array block (full-dim blocks waive the
        # (8,128) divisibility rule).  Only hit for tiny / odd shapes.
        flat = y.reshape(1, n)
        out = pl.pallas_call(
            _copy_kernel,
            out_shape=jax.ShapeDtypeStruct((1, n), dtype),
            in_specs=[pl.BlockSpec((1, n), lambda: (0, 0))],
            out_specs=pl.BlockSpec((1, n), lambda: (0, 0)),
            cost_estimate=bw_cost,
        )(flat)
        return out.reshape(out_shape)

    rows = n // cols
    bytes_per_row = cols * dtype.itemsize
    # ~1 MiB per buffer -> with double-buffered input + output this stays well
    # under v7x's 32 MiB default scoped VMEM while still hiding DMA latency.
    target_tile_bytes = 1 << 20
    tile_rows = max(8, (target_tile_bytes // bytes_per_row) // 8 * 8)
    if tile_rows >= rows:
        tile_rows = rows  # full-dim block (waives the multiple-of-8 rule)

    grid = (pl.cdiv(rows, tile_rows),)
    flat = y.reshape(rows, cols)  # contiguous -> metadata-only reshape

    out = pl.pallas_call(
        _copy_kernel,
        out_shape=jax.ShapeDtypeStruct((rows, cols), dtype),
        grid_spec=pltpu.PrefetchScalarGridSpec(
            num_scalar_prefetch=0,
            grid=grid,
            in_specs=[pl.BlockSpec((tile_rows, cols), lambda i: (i, 0))],
            out_specs=pl.BlockSpec((tile_rows, cols), lambda i: (i, 0)),
        ),
        compiler_params=pltpu.CompilerParams(
            dimension_semantics=("parallel",),
        ),
        cost_estimate=bw_cost,
    )(flat)
    return out.reshape(out_shape)


def squeeze_pallas(x, dim, *, materialize=False):
    """Pallas/JAX equivalent of torch.Tensor.squeeze(dim).

    Default path is metadata-only (free).  Set materialize=True to force a
    physical copy through the tiled Pallas kernel.
    """
    ndim = x.ndim
    d = dim % ndim  # torch allows negative dims

    if x.shape[d] != 1:
        # torch.squeeze(dim) is a no-op when that dim is not size 1.
        return x

    y = jnp.squeeze(x, axis=d)  # metadata-only
    if not materialize:
        return y
    return _materialized_copy(y)


if __name__ == "__main__":
    key = jax.random.PRNGKey(0)

    # Small NCHW-style input with a size-1 channel axis, squeeze dim=1.
    x = jax.random.normal(key, (2, 1, 16, 32), dtype=jnp.float32)
    dim = 1
    y_ref = jnp.squeeze(x, axis=dim)

    # 1) Production (metadata-only) path.
    y_fast = jax.block_until_ready(squeeze_pallas(x, dim))
    assert y_fast.shape == y_ref.shape and y_fast.dtype == y_ref.dtype
    assert bool(jnp.all(y_fast == y_ref))

    # 2) Materialized Pallas copy path (exercises the kernel).
    y_copy = jax.block_until_ready(squeeze_pallas(x, dim, materialize=True))
    assert y_copy.shape == y_ref.shape and y_copy.dtype == y_ref.dtype
    assert bool(jnp.all(y_copy == y_ref))

    # 3) Slightly larger (still tiny, 4 MiB) shape to exercise the multi-step
    #    pipelined grid path of the copy kernel.
    x_big = jax.random.normal(
        jax.random.PRNGKey(1), (8, 1, 256, 512), dtype=jnp.float32
    )
    y_big = jax.block_until_ready(squeeze_pallas(x_big, 1, materialize=True))
    assert bool(jnp.all(y_big == jnp.squeeze(x_big, axis=1)))

    # 4) Non-size-1 dim -> torch no-op; no kernel launch, returns x.
    x2 = jax.random.normal(
        jax.random.PRNGKey(2), (2, 4, 16, 32), dtype=jnp.float32
    )
    y2 = squeeze_pallas(x2, 1)
    assert y2.shape == x2.shape
    assert bool(jnp.all(y2 == x2))

    print("KERNEL_OK")
</pallas_src>

<mosaic_0001>
module attributes {stable_mosaic.version = 11 : i64} {
  func.func @_copy_kernel(%arg0: i32, %arg1: memref<1x1024xf32, #tpu.memory_space<vmem>>, %arg2: memref<1x1024xf32, #tpu.memory_space<vmem>>) attributes {dimension_semantics = [#tpu.dimension_semantics<parallel>], iteration_bounds = array<i64: 1>, scalar_prefetch = 0 : i64, scratch_operands = 0 : i64, tpu.core_type = #tpu.core_type<tc>, window_params = [{transform_indices = @transform_0, window_bounds = array<i64: 1, 1024>}, {transform_indices = @transform_1, window_bounds = array<i64: 1, 1024>}]} {
    %c0 = arith.constant 0 : index
    %c0_0 = arith.constant 0 : index
    %0 = vector.load %arg1[%c0, %c0_0] : memref<1x1024xf32, #tpu.memory_space<vmem>>, vector<1x1024xf32>
    %c0_1 = arith.constant 0 : index
    %c0_2 = arith.constant 0 : index
    %1 = vector.load %arg2[%c0_1, %c0_2] : memref<1x1024xf32, #tpu.memory_space<vmem>>, vector<1x1024xf32>
    tpu.vector_store %arg2[%c0_1, %c0_2], %0 {strides = array<i32>} : memref<1x1024xf32, #tpu.memory_space<vmem>>, vector<1x1024xf32>,
    return
  }
  func.func @transform_0(%arg0: i32) -> (i32, i32) {
    %c0_i32 = arith.constant 0 : i32
    %c0_i32_0 = arith.constant 0 : i32
    return %arg0, %c0_i32 : i32, i32
  }
  func.func @transform_1(%arg0: i32) -> (i32, i32) {
    %c0_i32 = arith.constant 0 : i32
    %c0_i32_0 = arith.constant 0 : i32
    return %arg0, %c0_i32 : i32, i32
  }
}

</mosaic_0001>

<bundles_post_ra>
// kernel: tpu_custom_call.1
= control target key start
LH: loop header
LB: loop body
LE: loop exit
PB: predicated region body
PF: predicated region fallthrough
CT: control target
= control target key end

     0   :  { %6 = vsyncpa [#allocation3], 0  ;;  %s124_s0 = inlined_call_operand.hbm [shape: f32[1,1024], index: 0, kind: input, shape index: {}]   ;;  %s125_s1 = inlined_call_operand.hbm [shape: f32[1,1024], index: 1, kind: output, shape index: {}]  }
   0x1   :  { %7 = vsyncpa [#allocation4], 0  ;;  %s88_s6 = smov [#allocation2]   ;;  %s40_s10 = scalar_lea.hbm %s124_s0, 128 }
   0x2   :  { %s14_s7 = sshll.u32 %s88_s6, 4  ;;  %p41_p0 = scmp.ne.s32.totalorder %s124_s0, %s40_s10  ;;  %s15_s7 = int_to_ptr.vmem [resolvable:$true] %s14_s7 }
   0x3   :  { %p44_p1 = scmp.lt.u32.totalorder %s40_s10, %s124_s0 }
   0x5   :  { %p46_p2 = pnand %p44_p1, %p41_p0 }
   0x7   :  { %49 = shalt.err (!%p46_p2)
}
   0x8   :  { %s50_s15 = scalar_lea.vmem %s15_s7, 128  ;;  %p55_p4 = scmp.lt.s32.totalorder %s15_s7, %s15_s7 }
   0x9   :  { %p51_p3 = scmp.ne.s32.totalorder %s15_s7, %s50_s15  ;;  %p56_p5 = scmp.lt.s32.totalorder %s50_s15, %s50_s15 }
   0xb   :  { %p57_p6 = por %p56_p5, %p55_p4 }
   0xd   :  { %p58_p7 = pnand %p57_p6, %p51_p3 }
   0xf   :  { %61 = shalt.err (!%p58_p7)
}
  0x10   :  { %17 = dma.hbm_to_vmem [thread:$0]  %s124_s0, 128, %s15_s7, [#allocation3]  }
  0x11   :  { %84 = dma.done.wait [#allocation3], 128  }
  0x12   :  { %85 = vsyncadd [#allocation3], 4294967168  ;;  %s89_s18 = smov [#allocation5]   ;;  %v21_v0 = vld [vmem:[#allocation2] sm:$0xff] }
  0x13   :  { %s29_s19 = sshll.u32 %s89_s18, 4  ;;  %22 = vst [vmem:[#allocation5] sm:$0xff] %v21_v0  ;;  %s30_s19 = int_to_ptr.vmem [resolvable:$true] %s29_s19 }
  0x14   :  { %s62_s20 = scalar_lea.vmem %s30_s19, 128  ;;  %p67_p9 = scmp.lt.s32.totalorder %s30_s19, %s30_s19 }
  0x15   :  { %p63_p8 = scmp.ne.s32.totalorder %s30_s19, %s62_s20  ;;  %p68_p10 = scmp.lt.s32.totalorder %s62_s20, %s62_s20 }
  0x17   :  { %p69_p11 = por %p68_p10, %p67_p9 }
  0x19   :  { %p70_p12 = pnand %p69_p11, %p63_p8 }
  0x1b   :  { %73 = shalt.err (!%p70_p12)
}
  0x1c   :  { %s74_s23 = scalar_lea.hbm %s125_s1, 128 }
  0x1d   :  { %p75_p13 = scmp.ne.s32.totalorder %s125_s1, %s74_s23  ;;  %p78_p0 = scmp.lt.u32.totalorder %s74_s23, %s125_s1 }
  0x1f   :  { %p80_p1 = pnand %p78_p0, %p75_p13 }
  0x21   :  { %83 = shalt.err (!%p80_p1)
}
  0x22   :  { %32 = dma.vmem_to_hbm [thread:$0]  %s30_s19, 128, %s125_s1, [#allocation4]  }
  0x23   :  { %86 = dma.done.wait [#allocation4], 128  }
  0x24   :  { %87 = vsyncadd [#allocation4], 4294967168 }
  0x25   :  { %36 = vsyncpa [#allocation3], 1 }
  0x26   :  { %37 = vsyncpa [#allocation4], 1 }

</bundles_post_ra>
